<compile_context>
chip_gen: v6e
topology: v6e:2x2x1
jax: 0.10.0
libtpu: 0.0.40
codegen_flags: <defaults>
</compile_context>

<pallas_src>
import functools

import jax
import jax.numpy as jnp
from jax.experimental import pallas as pl
from jax.experimental.pallas import tpu as pltpu


def _round_up(x, m):
    return ((x + m - 1) // m) * m


# ----------------------------------------------------------------------------
# Fused kernel: stem 3x3/s2 conv -> 1x1 conv -> masked GAP -> classifier -> NLL
# ----------------------------------------------------------------------------
def _fused_kernel(labels_ref,                                     # SMEM (B,) int32
                  zf_ref, pool_ref, ws_ref, bs_ref, wh_ref, bh_ref, wc_ref, bc_ref,
                  logits_ref, nll_ref,
                  *, shifts, n_out, num_classes):
    # --- stem: 3x3/s2 conv as 4 shifted matmuls over the phase-packed image --------
    # zf_ref: (Nz_pad, 4*Cin) f32; shifts are static row offsets {0, 1, Wz, Wz+1}.
    h1 = jnp.dot(zf_ref[shifts[0]:shifts[0] + n_out, :].astype(jnp.bfloat16),
                 ws_ref[0], preferred_element_type=jnp.float32)
    for k in range(1, 4):
        h1 = h1 + jnp.dot(zf_ref[shifts[k]:shifts[k] + n_out, :].astype(jnp.bfloat16),
                          ws_ref[k], preferred_element_type=jnp.float32)
    h1 = h1 + bs_ref[...]                      # fused-BN shift
    h1 = h1 * jax.nn.sigmoid(h1)               # SiLU (f32)

    # --- pointwise 1x1 "head" conv + SiLU; activations never leave VMEM/vregs ------
    h2 = jnp.dot(h1.astype(jnp.bfloat16), wh_ref[...],
                 preferred_element_type=jnp.float32) + bh_ref[...]
    # TODO(synk): on v6e/v7x this SiLU could run in bf16 (bf16 VPU/EUP); kept f32 so
    #             the same kernel stays safe/optimal on v5e.
    h2 = h2 * jax.nn.sigmoid(h2)               # (n_out, head_c) f32

    # --- masked global average pool as one (1, n_out) x (n_out, head_c) matmul -----
    feat = jnp.dot(pool_ref[...], h2, preferred_element_type=jnp.float32)  # (1, head_c)

    # --- classifier (bf16 weights, f32 accumulation), lane-dense padded output -----
    logits = jnp.dot(feat.astype(jnp.bfloat16), wc_ref[...],
                     preferred_element_type=jnp.float32) + bc_ref[...]     # (1, nc_pad)
    logits_ref[...] = logits

    # --- fused softmax cross-entropy NLL for this example (labels live in SMEM) ----
    lab = labels_ref[pl.program_id(0)]
    lane = jax.lax.broadcasted_iota(jnp.int32, logits.shape, 1)
    valid = lane < num_classes
    masked = jnp.where(valid, logits, jnp.float32(-1e30))
    m = jnp.max(masked, axis=-1, keepdims=True)
    lse = m + jnp.log(jnp.sum(jnp.where(valid, jnp.exp(masked - m), 0.0),
                              axis=-1, keepdims=True))
    tgt = jnp.sum(jnp.where(lane == lab, logits, 0.0), axis=-1, keepdims=True)
    nll_ref[...] = lse - tgt


def fused_backbone_forward(labels, zf, pool, ws4, b_stem, w_head, b_head, w_cls, b_cls,
                           *, wz, num_classes):
    """zf: (B, Nz_pad, 4*Cin) f32 flattened phase image.  Returns (logits_pad, nll)."""
    B, nz_pad, c4 = zf.shape
    n_out = pool.shape[1]
    stem_c = ws4.shape[2]
    head_c = w_head.shape[1]
    nc_pad = w_cls.shape[1]
    shifts = (0, 1, wz, wz + 1)
    assert nz_pad >= n_out + shifts[-1]

    kernel = functools.partial(_fused_kernel, shifts=shifts, n_out=n_out,
                               num_classes=num_classes)
    grid_spec = pltpu.PrefetchScalarGridSpec(
        num_scalar_prefetch=1,                 # labels -> SMEM
        grid=(B,),
        in_specs=[
            pl.BlockSpec((None, nz_pad, c4), lambda b, lab: (b, 0, 0)),   # phase image
            pl.BlockSpec((1, n_out),         lambda b, lab: (0, 0)),      # GAP weights
            pl.BlockSpec((4, c4, stem_c),    lambda b, lab: (0, 0, 0)),   # stem taps
            pl.BlockSpec((1, stem_c),        lambda b, lab: (0, 0)),
            pl.BlockSpec((stem_c, head_c),   lambda b, lab: (0, 0)),
            pl.BlockSpec((1, head_c),        lambda b, lab: (0, 0)),
            pl.BlockSpec((head_c, nc_pad),   lambda b, lab: (0, 0)),
            pl.BlockSpec((1, nc_pad),        lambda b, lab: (0, 0)),
        ],
        out_specs=[
            pl.BlockSpec((None, 1, nc_pad), lambda b, lab: (b, 0, 0)),    # padded logits
            pl.BlockSpec((None, 1, 1),      lambda b, lab: (b, 0, 0)),    # per-example NLL
        ],
    )
    logits_pad, nll = pl.pallas_call(
        kernel,
        out_shape=(jax.ShapeDtypeStruct((B, 1, nc_pad), jnp.float32),
                   jax.ShapeDtypeStruct((B, 1, 1), jnp.float32)),
        grid_spec=grid_spec,
        compiler_params=pltpu.CompilerParams(
            dimension_semantics=("parallel",),       # batch split across TCs on v7x
            vmem_limit_bytes=32 * 1024 * 1024,       # well under v7x's 64 MiB VMEM
        ),
    )(labels, zf, pool, ws4, b_stem, w_head, b_head, w_cls, b_cls)
    return logits_pad.reshape(B, nc_pad), nll.reshape(B)


# ----------------------------------------------------------------------------
# Plain-JAX glue (zero-expansion layout prep only)
# ----------------------------------------------------------------------------
def init_params(key, c_in=3, stem_c=32, head_c=128, num_classes=2):
    ks = jax.random.split(key, 6)
    scale = 0.1
    return {
        # stem conv weight, feature order (i, j, c); BN fused (scale in w, shift in b)
        "w_stem": scale * jax.random.normal(ks[0], (3 * 3 * c_in, stem_c), jnp.float32),
        "b_stem": scale * jax.random.normal(ks[1], (stem_c,), jnp.float32),
        # 1x1 pointwise "head" conv (+fused BN); head_c=128 keeps lanes dense
        "w_head": scale * jax.random.normal(ks[2], (stem_c, head_c), jnp.float32),
        "b_head": scale * jax.random.normal(ks[3], (head_c,), jnp.float32),
        # classifier
        "w_cls": scale * jax.random.normal(ks[4], (head_c, num_classes), jnp.float32),
        "b_cls": scale * jax.random.normal(ks[5], (num_classes,), jnp.float32),
    }


def timm_model_forward(params, pixel_values, labels=None, num_classes=2):
    """Mirrors TimmModelForImageClassification.forward semantics."""
    # NCHW (PyTorch) -> NHWC for the TPU kernel.
    x = jnp.transpose(pixel_values.astype(jnp.float32), (0, 2, 3, 1))
    B, H, W, C = x.shape
    assert H % 2 == 0 and W % 2 == 0, "stride-2 stem assumes even spatial dims"
    Ho, Wo = H // 2, W // 2                  # stem conv output grid (3x3/s2/p1)
    Hz, Wz = Ho + 1, Wo + 1                  # phase-packed grid
    C4 = 4 * C

    # pad=1 + stride-2 space-to-depth phase packing (pure reshape/transpose, no
    # data expansion -- unlike the previous materialized im2col tensor).
    xp = jnp.pad(x, ((0, 0), (1, 1), (1, 1), (0, 0)))
    z = xp.reshape(B, Hz, 2, Wz, 2, C).transpose(0, 1, 3, 2, 4, 5).reshape(B, Hz, Wz, C4)

    # Flatten spatial; pad rows so every shifted tap slice stays in range.
    n_valid = Hz * Wz
    n_out = _round_up(n_valid, 8)
    nz_pad = _round_up(n_out + Wz + 1, 8)
    # TODO(synk): the phase image could be stored bf16 to halve its (already small)
    #             HBM read; kept f32 so the odd-row-offset tap loads are plain 32-bit
    #             sublane-offset loads.
    zf = jnp.pad(z.reshape(B, n_valid, C4), ((0, 0), (0, nz_pad - n_valid), (0, 0)))

    # Masked-GAP pooling vector: 1/HW at valid conv-output positions, 0 at the
    # phase-grid border / padded rows (replaces all in-kernel masking).
    n_idx = jnp.arange(n_out)
    valid = (n_idx // Wz < Ho) & (n_idx % Wz < Wo) & (n_idx < n_valid)
    pool = (valid.astype(jnp.float32) / float(Ho * Wo)).reshape(1, n_out)

    stem_c = params["w_stem"].shape[1]
    head_c = params["w_head"].shape[1]
    nc_pad = _round_up(max(num_classes, 128), 128)

    # Stem weight (kh*kw*Cin, Cout) -> 4-tap space-to-depth layout
    # (dr*2+ds, (p*2+q)*Cin + c, Cout), zeros where the 3x3 window misses the phase.
    w33 = params["w_stem"].reshape(3, 3, C, stem_c)
    ws4 = jnp.zeros((2, 2, 2, 2, C, stem_c), jnp.float32)
    for i in range(3):
        for j in range(3):
            ws4 = ws4.at[i // 2, j // 2, i % 2, j % 2].set(w33[i, j])
    ws4 = ws4.reshape(4, C4, stem_c).astype(jnp.bfloat16)

    b_stem = params["b_stem"].reshape(1, stem_c).astype(jnp.float32)
    w_head = params["w_head"].astype(jnp.bfloat16)
    b_head = params["b_head"].reshape(1, head_c).astype(jnp.float32)
    w_cls = jnp.pad(params["w_cls"],
                    ((0, 0), (0, nc_pad - num_classes))).astype(jnp.bfloat16)
    b_cls = jnp.pad(params["b_cls"],
                    (0, nc_pad - num_classes)).reshape(1, nc_pad).astype(jnp.float32)

    lab = labels.astype(jnp.int32) if labels is not None else jnp.zeros((B,), jnp.int32)

    logits_pad, nll = fused_backbone_forward(
        lab, zf, pool, ws4, b_stem, w_head, b_head, w_cls, b_cls,
        wz=Wz, num_classes=num_classes)

    logits = logits_pad[:, :num_classes]
    if labels is not None:
        return {"loss": jnp.mean(nll), "logits": logits}
    return {"logits": logits}


def _reference_logits(params, pixel_values):
    """Plain-JAX f32 reference of the same forward math (self-test only)."""
    x = jnp.transpose(pixel_values.astype(jnp.float32), (0, 2, 3, 1))
    B, H, W, C = x.shape
    Ho, Wo = H // 2, W // 2
    xp = jnp.pad(x, ((0, 0), (1, 1), (1, 1), (0, 0)))
    cols = []
    for i in range(3):
        for j in range(3):
            cols.append(xp[:, i:i + 2 * Ho:2, j:j + 2 * Wo:2, :])
    p = jnp.stack(cols, axis=3).reshape(B, Ho * Wo, 9 * C)
    h1 = p @ params["w_stem"] + params["b_stem"]
    h1 = h1 * jax.nn.sigmoid(h1)
    h2 = h1 @ params["w_head"] + params["b_head"]
    h2 = h2 * jax.nn.sigmoid(h2)
    feat = jnp.mean(h2, axis=1)
    return feat @ params["w_cls"] + params["b_cls"]


# ----------------------------------------------------------------------------
if __name__ == "__main__":
    key = jax.random.PRNGKey(0)
    k_param, k_pix, k_lab = jax.random.split(key, 3)

    B, C, H, W = 2, 3, 16, 16
    num_classes = 2

    params = init_params(k_param, c_in=C, num_classes=num_classes)
    pixel_values = jax.random.normal(k_pix, (B, C, H, W), jnp.float32)   # NCHW like PyTorch
    labels = jax.random.randint(k_lab, (B,), 0, num_classes)

    out = timm_model_forward(params, pixel_values, labels=labels, num_classes=num_classes)
    jax.block_until_ready(out)

    assert out["logits"].shape == (B, num_classes)
    assert out["loss"].shape == ()
    assert bool(jnp.isfinite(out["loss"]))

    # Numerical self-check vs. a plain-JAX f32 reference (kernel path uses bf16
    # operands, hence the loose tolerance).
    ref_logits = _reference_logits(params, pixel_values)
    assert float(jnp.max(jnp.abs(out["logits"] - ref_logits))) < 7.5e-2

    lg = out["logits"].astype(jnp.float32)
    ref_loss = jnp.mean(jax.nn.logsumexp(lg, axis=-1)
                        - jnp.take_along_axis(lg, labels[:, None].astype(jnp.int32),
                                              axis=-1)[:, 0])
    assert abs(float(out["loss"]) - float(ref_loss)) < 1e-4

    out_no_labels = timm_model_forward(params, pixel_values, labels=None,
                                       num_classes=num_classes)
    jax.block_until_ready(out_no_labels)
    assert set(out_no_labels.keys()) == {"logits"}

    print("KERNEL_OK")
</pallas_src>

<mosaic_0001>
module attributes {stable_mosaic.version = 11 : i64} {
  func.func @_fused_kernel(%arg0: i32, %arg1: memref<2xi32, #tpu.memory_space<smem>>, %arg2: memref<1x104x12xf32, #tpu.memory_space<vmem>>, %arg3: memref<1x88xf32, #tpu.memory_space<vmem>>, %arg4: memref<4x12x32xbf16, #tpu.memory_space<vmem>>, %arg5: memref<1x32xf32, #tpu.memory_space<vmem>>, %arg6: memref<32x128xbf16, #tpu.memory_space<vmem>>, %arg7: memref<1x128xf32, #tpu.memory_space<vmem>>, %arg8: memref<128x128xbf16, #tpu.memory_space<vmem>>, %arg9: memref<1x128xf32, #tpu.memory_space<vmem>>, %arg10: memref<1x1x128xf32, #tpu.memory_space<vmem>>, %arg11: memref<1x1x1xf32, #tpu.memory_space<vmem>>) attributes {dimension_semantics = [#tpu.dimension_semantics<parallel>], iteration_bounds = array<i64: 2>, scalar_prefetch = 1 : i64, scratch_operands = 0 : i64, tpu.core_type = #tpu.core_type<tc>, window_params = [{transform_indices = @transform_0, window_bounds = array<i64: 1, 104, 12>}, {pipeline_mode = #tpu.pipeline_mode<synchronous>, transform_indices = @transform_1, window_bounds = array<i64: 1, 88>}, {pipeline_mode = #tpu.pipeline_mode<synchronous>, transform_indices = @transform_2, window_bounds = array<i64: 4, 12, 32>}, {pipeline_mode = #tpu.pipeline_mode<synchronous>, transform_indices = @transform_3, window_bounds = array<i64: 1, 32>}, {pipeline_mode = #tpu.pipeline_mode<synchronous>, transform_indices = @transform_4, window_bounds = array<i64: 32, 128>}, {pipeline_mode = #tpu.pipeline_mode<synchronous>, transform_indices = @transform_5, window_bounds = array<i64: 1, 128>}, {pipeline_mode = #tpu.pipeline_mode<synchronous>, transform_indices = @transform_6, window_bounds = array<i64: 128, 128>}, {pipeline_mode = #tpu.pipeline_mode<synchronous>, transform_indices = @transform_7, window_bounds = array<i64: 1, 128>}, {transform_indices = @transform_8, window_bounds = array<i64: 1, 1, 128>}, {transform_indices = @transform_9, window_bounds = array<i64: 1, 1, 1>}]} {
    %c0 = arith.constant 0 : index
    %c0_0 = arith.constant 0 : index
    %c0_1 = arith.constant 0 : index
    %0 = vector.load %arg2[%c0, %c0_0, %c0_1] : memref<1x104x12xf32, #tpu.memory_space<vmem>>, vector<1x88x12xf32>
    %1 = vector.shape_cast %0 : vector<1x88x12xf32> to vector<88x12xf32>
    %2 = arith.truncf %1 : vector<88x12xf32> to vector<88x12xbf16>
    %c0_2 = arith.constant 0 : index
    %c0_3 = arith.constant 0 : index
    %c0_4 = arith.constant 0 : index
    %3 = vector.load %arg4[%c0_2, %c0_3, %c0_4] : memref<4x12x32xbf16, #tpu.memory_space<vmem>>, vector<1x12x32xbf16>
    %4 = vector.shape_cast %3 : vector<1x12x32xbf16> to vector<12x32xbf16>
    %cst = arith.constant dense<0.000000e+00> : vector<88x32xf32>
    %5 = tpu.matmul %2, %4, %cst {dimension_numbers = #tpu.dot_dimension_numbers<[1], [0], [0], [1], [0, 0, 1, 1], [], []>} : vector<88x12xbf16>, vector<12x32xbf16>, vector<88x32xf32> -> vector<88x32xf32>
    %c0_5 = arith.constant 0 : index
    %c1 = arith.constant 1 : index
    %c0_6 = arith.constant 0 : index
    %6 = vector.load %arg2[%c0_5, %c1, %c0_6] : memref<1x104x12xf32, #tpu.memory_space<vmem>>, vector<1x88x12xf32>
    %7 = vector.shape_cast %6 : vector<1x88x12xf32> to vector<88x12xf32>
    %8 = arith.truncf %7 : vector<88x12xf32> to vector<88x12xbf16>
    %c1_7 = arith.constant 1 : index
    %c0_8 = arith.constant 0 : index
    %c0_9 = arith.constant 0 : index
    %9 = vector.load %arg4[%c1_7, %c0_8, %c0_9] : memref<4x12x32xbf16, #tpu.memory_space<vmem>>, vector<1x12x32xbf16>
    %10 = vector.shape_cast %9 : vector<1x12x32xbf16> to vector<12x32xbf16>
    %cst_10 = arith.constant dense<0.000000e+00> : vector<88x32xf32>
    %11 = tpu.matmul %8, %10, %cst_10 {dimension_numbers = #tpu.dot_dimension_numbers<[1], [0], [0], [1], [0, 0, 1, 1], [], []>} : vector<88x12xbf16>, vector<12x32xbf16>, vector<88x32xf32> -> vector<88x32xf32>
    %12 = arith.addf %5, %11 : vector<88x32xf32>
    %c0_11 = arith.constant 0 : index
    %c9 = arith.constant 9 : index
    %c0_12 = arith.constant 0 : index
    %13 = vector.load %arg2[%c0_11, %c9, %c0_12] : memref<1x104x12xf32, #tpu.memory_space<vmem>>, vector<1x88x12xf32>
    %14 = vector.shape_cast %13 : vector<1x88x12xf32> to vector<88x12xf32>
    %15 = arith.truncf %14 : vector<88x12xf32> to vector<88x12xbf16>
    %c2 = arith.constant 2 : index
    %c0_13 = arith.constant 0 : index
    %c0_14 = arith.constant 0 : index
    %16 = vector.load %arg4[%c2, %c0_13, %c0_14] : memref<4x12x32xbf16, #tpu.memory_space<vmem>>, vector<1x12x32xbf16>
    %17 = vector.shape_cast %16 : vector<1x12x32xbf16> to vector<12x32xbf16>
    %cst_15 = arith.constant dense<0.000000e+00> : vector<88x32xf32>
    %18 = tpu.matmul %15, %17, %cst_15 {dimension_numbers = #tpu.dot_dimension_numbers<[1], [0], [0], [1], [0, 0, 1, 1], [], []>} : vector<88x12xbf16>, vector<12x32xbf16>, vector<88x32xf32> -> vector<88x32xf32>
    %19 = arith.addf %12, %18 : vector<88x32xf32>
    %c0_16 = arith.constant 0 : index
    %c10 = arith.constant 10 : index
    %c0_17 = arith.constant 0 : index
    %20 = vector.load %arg2[%c0_16, %c10, %c0_17] : memref<1x104x12xf32, #tpu.memory_space<vmem>>, vector<1x88x12xf32>
    %21 = vector.shape_cast %20 : vector<1x88x12xf32> to vector<88x12xf32>
    %22 = arith.truncf %21 : vector<88x12xf32> to vector<88x12xbf16>
    %c3 = arith.constant 3 : index
    %c0_18 = arith.constant 0 : index
    %c0_19 = arith.constant 0 : index
    %23 = vector.load %arg4[%c3, %c0_18, %c0_19] : memref<4x12x32xbf16, #tpu.memory_space<vmem>>, vector<1x12x32xbf16>
    %24 = vector.shape_cast %23 : vector<1x12x32xbf16> to vector<12x32xbf16>
    %cst_20 = arith.constant dense<0.000000e+00> : vector<88x32xf32>
    %25 = tpu.matmul %22, %24, %cst_20 {dimension_numbers = #tpu.dot_dimension_numbers<[1], [0], [0], [1], [0, 0, 1, 1], [], []>} : vector<88x12xbf16>, vector<12x32xbf16>, vector<88x32xf32> -> vector<88x32xf32>
    %26 = arith.addf %19, %25 : vector<88x32xf32>
    %c0_21 = arith.constant 0 : index
    %c0_22 = arith.constant 0 : index
    %27 = vector.load %arg5[%c0_21, %c0_22] : memref<1x32xf32, #tpu.memory_space<vmem>>, vector<1x32xf32>
    %28 = vector.broadcast %27 : vector<1x32xf32> to vector<88x32xf32>
    %29 = arith.addf %26, %28 : vector<88x32xf32>
    %30 = arith.negf %29 : vector<88x32xf32>
    %31 = math.exp %30 : vector<88x32xf32>
    %cst_23 = arith.constant 1.000000e+00 : f32
    %32 = vector.broadcast %cst_23 : f32 to vector<88x32xf32>
    %33 = arith.addf %32, %31 : vector<88x32xf32>
    %34 = arith.divf %32, %33 : vector<88x32xf32>
    %35 = arith.mulf %29, %34 : vector<88x32xf32>
    %36 = arith.truncf %35 : vector<88x32xf32> to vector<88x32xbf16>
    %c0_24 = arith.constant 0 : index
    %c0_25 = arith.constant 0 : index
    %37 = vector.load %arg6[%c0_24, %c0_25] : memref<32x128xbf16, #tpu.memory_space<vmem>>, vector<32x128xbf16>
    %cst_26 = arith.constant dense<0.000000e+00> : vector<88x128xf32>
    %38 = tpu.matmul %36, %37, %cst_26 {dimension_numbers = #tpu.dot_dimension_numbers<[1], [0], [0], [1], [0, 0, 1, 1], [], []>} : vector<88x32xbf16>, vector<32x128xbf16>, vector<88x128xf32> -> vector<88x128xf32>
    %c0_27 = arith.constant 0 : index
    %c0_28 = arith.constant 0 : index
    %39 = vector.load %arg7[%c0_27, %c0_28] : memref<1x128xf32, #tpu.memory_space<vmem>>, vector<1x128xf32>
    %40 = vector.broadcast %39 : vector<1x128xf32> to vector<88x128xf32>
    %41 = arith.addf %38, %40 : vector<88x128xf32>
    %42 = arith.negf %41 : vector<88x128xf32>
    %43 = math.exp %42 : vector<88x128xf32>
    %cst_29 = arith.constant 1.000000e+00 : f32
    %44 = vector.broadcast %cst_29 : f32 to vector<88x128xf32>
    %45 = arith.addf %44, %43 : vector<88x128xf32>
    %46 = arith.divf %44, %45 : vector<88x128xf32>
    %47 = arith.mulf %41, %46 : vector<88x128xf32>
    %c0_30 = arith.constant 0 : index
    %c0_31 = arith.constant 0 : index
    %48 = vector.load %arg3[%c0_30, %c0_31] : memref<1x88xf32, #tpu.memory_space<vmem>>, vector<1x88xf32>
    %cst_32 = arith.constant dense<0.000000e+00> : vector<1x128xf32>
    %49 = tpu.matmul %48, %47, %cst_32 {dimension_numbers = #tpu.dot_dimension_numbers<[1], [0], [0], [1], [0, 0, 1, 1], [], []>} : vector<1x88xf32>, vector<88x128xf32>, vector<1x128xf32> -> vector<1x128xf32>
    %50 = arith.truncf %49 : vector<1x128xf32> to vector<1x128xbf16>
    %c0_33 = arith.constant 0 : index
    %c0_34 = arith.constant 0 : index
    %51 = vector.load %arg8[%c0_33, %c0_34] : memref<128x128xbf16, #tpu.memory_space<vmem>>, vector<128x128xbf16>
    %cst_35 = arith.constant dense<0.000000e+00> : vector<1x128xf32>
    %52 = tpu.matmul %50, %51, %cst_35 {dimension_numbers = #tpu.dot_dimension_numbers<[1], [0], [0], [1], [0, 0, 1, 1], [], []>} : vector<1x128xbf16>, vector<128x128xbf16>, vector<1x128xf32> -> vector<1x128xf32>
    %c0_36 = arith.constant 0 : index
    %c0_37 = arith.constant 0 : index
    %53 = vector.load %arg9[%c0_36, %c0_37] : memref<1x128xf32, #tpu.memory_space<vmem>>, vector<1x128xf32>
    %54 = arith.addf %52, %53 : vector<1x128xf32>
    %c0_38 = arith.constant 0 : index
    %c0_39 = arith.constant 0 : index
    %c0_40 = arith.constant 0 : index
    %55 = vector.load %arg10[%c0_38, %c0_39, %c0_40] : memref<1x1x128xf32, #tpu.memory_space<vmem>>, vector<1x1x128xf32>
    %56 = vector.shape_cast %55 : vector<1x1x128xf32> to vector<1x128xf32>
    %57 = vector.shape_cast %54 : vector<1x128xf32> to vector<1x1x128xf32>
    tpu.vector_store %arg10[%c0_38, %c0_39, %c0_40], %57 {strides = array<i32>} : memref<1x1x128xf32, #tpu.memory_space<vmem>>, vector<1x1x128xf32>,
    %58 = arith.index_cast %arg0 : i32 to index
    %59 = memref.load %arg1[%58] : memref<2xi32, #tpu.memory_space<smem>>
    %60 = tpu.iota {dimensions = array<i32: 1>} : vector<1x128xi32>
    %c2_i32 = arith.constant 2 : i32
    %61 = vector.broadcast %c2_i32 : i32 to vector<1x128xi32>
    %62 = arith.cmpi slt, %60, %61 : vector<1x128xi32>
    %cst_41 = arith.constant -1.000000e+30 : f32
    %63 = vector.broadcast %cst_41 : f32 to vector<1x128xf32>
    %64 = arith.select %62, %54, %63 : vector<1x128xi1>, vector<1x128xf32>
    %cst_42 = arith.constant dense<0xFF800000> : vector<1xf32>
    %65 = vector.multi_reduction <maximumf>, %64, %cst_42 [1] : vector<1x128xf32> to vector<1xf32>
    %66 = vector.shape_cast %65 : vector<1xf32> to vector<1x1xf32>
    %67 = vector.broadcast %66 : vector<1x1xf32> to vector<1x128xf32>
    %68 = arith.subf %64, %67 : vector<1x128xf32>
    %69 = math.exp %68 : vector<1x128xf32>
    %cst_43 = arith.constant 0.000000e+00 : f32
    %70 = vector.broadcast %cst_43 : f32 to vector<1x128xf32>
    %71 = arith.select %62, %69, %70 : vector<1x128xi1>, vector<1x128xf32>
    %cst_44 = arith.constant dense<0.000000e+00> : vector<1xf32>
    %72 = vector.multi_reduction <add>, %71, %cst_44 [1] : vector<1x128xf32> to vector<1xf32>
    %73 = vector.shape_cast %72 : vector<1xf32> to vector<1x1xf32>
    %74 = math.log %73 : vector<1x1xf32>
    %75 = arith.addf %66, %74 : vector<1x1xf32>
    %76 = vector.broadcast %59 : i32 to vector<1x128xi32>
    %77 = arith.cmpi eq, %60, %76 : vector<1x128xi32>
    %cst_45 = arith.constant 0.000000e+00 : f32
    %78 = vector.broadcast %cst_45 : f32 to vector<1x128xf32>
    %79 = arith.select %77, %54, %78 : vector<1x128xi1>, vector<1x128xf32>
    %cst_46 = arith.constant dense<0.000000e+00> : vector<1xf32>
    %80 = vector.multi_reduction <add>, %79, %cst_46 [1] : vector<1x128xf32> to vector<1xf32>
    %81 = vector.shape_cast %80 : vector<1xf32> to vector<1x1xf32>
    %82 = arith.subf %75, %81 : vector<1x1xf32>
    %c0_47 = arith.constant 0 : index
    %c0_48 = arith.constant 0 : index
    %c0_49 = arith.constant 0 : index
    %83 = vector.load %arg11[%c0_47, %c0_48, %c0_49] : memref<1x1x1xf32, #tpu.memory_space<vmem>>, vector<1x1x1xf32>
    %84 = vector.shape_cast %83 : vector<1x1x1xf32> to vector<1x1xf32>
    %85 = vector.shape_cast %82 : vector<1x1xf32> to vector<1x1x1xf32>
    tpu.vector_store %arg11[%c0_47, %c0_48, %c0_49], %85 {strides = array<i32>} : memref<1x1x1xf32, #tpu.memory_space<vmem>>, vector<1x1x1xf32>,
    return
  }
  func.func @transform_0(%arg0: i32, %arg1: memref<2xi32, #tpu.memory_space<smem>>) -> (i32, i32, i32) {
    %c0_i32 = arith.constant 0 : i32
    %c0_i32_0 = arith.constant 0 : i32
    %c0_i32_1 = arith.constant 0 : i32
    return %arg0, %c0_i32, %c0_i32_0 : i32, i32, i32
  }
  func.func @transform_1(%arg0: i32, %arg1: memref<2xi32, #tpu.memory_space<smem>>) -> (i32, i32) {
    %c0_i32 = arith.constant 0 : i32
    %c0_i32_0 = arith.constant 0 : i32
    %c0_i32_1 = arith.constant 0 : i32
    return %c0_i32, %c0_i32_0 : i32, i32
  }
  func.func @transform_2(%arg0: i32, %arg1: memref<2xi32, #tpu.memory_space<smem>>) -> (i32, i32, i32) {
    %c0_i32 = arith.constant 0 : i32
    %c0_i32_0 = arith.constant 0 : i32
    %c0_i32_1 = arith.constant 0 : i32
    %c0_i32_2 = arith.constant 0 : i32
    return %c0_i32, %c0_i32_0, %c0_i32_1 : i32, i32, i32
  }
  func.func @transform_3(%arg0: i32, %arg1: memref<2xi32, #tpu.memory_space<smem>>) -> (i32, i32) {
    %c0_i32 = arith.constant 0 : i32
    %c0_i32_0 = arith.constant 0 : i32
    %c0_i32_1 = arith.constant 0 : i32
    return %c0_i32, %c0_i32_0 : i32, i32
  }
  func.func @transform_4(%arg0: i32, %arg1: memref<2xi32, #tpu.memory_space<smem>>) -> (i32, i32) {
    %c0_i32 = arith.constant 0 : i32
    %c0_i32_0 = arith.constant 0 : i32
    %c0_i32_1 = arith.constant 0 : i32
    return %c0_i32, %c0_i32_0 : i32, i32
  }
  func.func @transform_5(%arg0: i32, %arg1: memref<2xi32, #tpu.memory_space<smem>>) -> (i32, i32) {
    %c0_i32 = arith.constant 0 : i32
    %c0_i32_0 = arith.constant 0 : i32
    %c0_i32_1 = arith.constant 0 : i32
    return %c0_i32, %c0_i32_0 : i32, i32
  }
  func.func @transform_6(%arg0: i32, %arg1: memref<2xi32, #tpu.memory_space<smem>>) -> (i32, i32) {
    %c0_i32 = arith.constant 0 : i32
    %c0_i32_0 = arith.constant 0 : i32
    %c0_i32_1 = arith.constant 0 : i32
    return %c0_i32, %c0_i32_0 : i32, i32
  }
  func.func @transform_7(%arg0: i32, %arg1: memref<2xi32, #tpu.memory_space<smem>>) -> (i32, i32) {
    %c0_i32 = arith.constant 0 : i32
    %c0_i32_0 = arith.constant 0 : i32
    %c0_i32_1 = arith.constant 0 : i32
    return %c0_i32, %c0_i32_0 : i32, i32
  }
  func.func @transform_8(%arg0: i32, %arg1: memref<2xi32, #tpu.memory_space<smem>>) -> (i32, i32, i32) {
    %c0_i32 = arith.constant 0 : i32
    %c0_i32_0 = arith.constant 0 : i32
    %c0_i32_1 = arith.constant 0 : i32
    return %arg0, %c0_i32, %c0_i32_0 : i32, i32, i32
  }
  func.func @transform_9(%arg0: i32, %arg1: memref<2xi32, #tpu.memory_space<smem>>) -> (i32, i32, i32) {
    %c0_i32 = arith.constant 0 : i32
    %c0_i32_0 = arith.constant 0 : i32
    %c0_i32_1 = arith.constant 0 : i32
    return %arg0, %c0_i32, %c0_i32_0 : i32, i32, i32
  }
}

</mosaic_0001>

<bundles_post_ra>
// kernel: tpu_custom_call.1
= control target key start
LH: loop header
LB: loop body
LE: loop exit
PB: predicated region body
PF: predicated region fallthrough
CT: control target
= control target key end

     0   :  { %s2380_s0 = inlined_call_operand.vmem [shape: s32[2], index: 0, kind: input, shape index: {}]   ;;  %s2381_s1 = inlined_call_operand.vmem [shape: f32[2,104,12], index: 1, kind: input, shape index: {}]   ;;  %s2382_s2 = inlined_call_operand.vmem [shape: f32[1,88], index: 2, kind: input, shape index: {}]   ;;  %s2383_s3 = inlined_call_operand.vmem [shape: bf16[4,12,32], index: 3, kind: input, shape index: {}]   ;;  %s2384_s4 = inlined_call_operand.vmem [shape: f32[1,32], index: 4, kind: input, shape index: {}]   ;;  %s2385_s5 = inlined_call_operand.vmem [shape: bf16[32,128], index: 5, kind: input, shape index: {}]   ;;  %s2386_s6 = inlined_call_operand.vmem [shape: f32[1,128], index: 6, kind: input, shape index: {}]   ;;  %s2387_s7 = inlined_call_operand.vmem [shape: bf16[128,128], index: 7, kind: input, shape index: {}]   ;;  %s2388_s8 = inlined_call_operand.vmem [shape: f32[1,128], index: 8, kind: input, shape index: {}]   ;;  %s2389_s9 = inlined_call_operand.hbm [shape: f32[2,1,128], index: 9, kind: output, shape index: {0}]   ;;  %s2390_s10 = inlined_call_operand.vmem [shape: f32[2,1,1], index: 10, kind: output, shape index: {1}]  }
   0x1   :  { %2391 = sst [smem:[#allocation8_spill]] %s2381_s1  ;;  %s16_s15 = sshll.u32 %s2380_s0, 4  ;;  %s17_s15 = int_to_ptr.vmem [resolvable:$true] %s16_s15 }
   0x2   :  { %s1890_s16 = scalar_lea.vmem %s17_s15, 16  ;;  %p1895_p1 = scmp.lt.s32.totalorder %s17_s15, %s17_s15 }
   0x3   :  { %p1891_p0 = scmp.ne.s32.totalorder %s17_s15, %s1890_s16  ;;  %p1896_p2 = scmp.lt.s32.totalorder %s1890_s16, %s1890_s16 }
   0x5   :  { %p1897_p3 = por %p1896_p2, %p1895_p1 }
   0x7   :  { %p1898_p4 = pnand %p1897_p3, %p1891_p0 }
   0x9   :  { %1901 = shalt.err (!%p1898_p4)  }
   0xa   :  { %s1966_s17 = smov [#allocation3]  }
   0xb   :  { %19 = dma.vmem_to_smem %s17_s15, 16, %s1966_s17, [#allocation2] }
   0xc   :  { %1944 = dma.done.wait [#allocation2], 16 }
   0xd   :  { %1945 = vsyncadd [#allocation2], 4294967280 }
   0xe   :  { %21 = sfence }
   0xf   :  { %22 = vsyncpa [#allocation5], 0 }
  0x10   :  { %24 = vsyncpa [#allocation5 + $0x1], 0  ;;  %s2028_s18 = smov 0   ;;  %s2030_s19 = smov 0  }
  0x11   :  { %s2032_s0 = smov 0   ;;  %s2034_s20 = smov 0  }
  0x12 LB: > { %s2049_s21 = sadd.s32 4294967295, %s1964_s20   ;;  %s1477_s22 = sadd.s32 4294967294, %s1964_s20   ;;  %s1964_s20 = sphi %s2034_s20, %s2398_s20   ;;  %s1960_s0 = sphi %s2032_s0, %s2397_s0   ;;  %s1956_s19 = sphi %s2030_s19, %s2396_s19   ;;  %s1952_s18 = sphi %s2028_s18, %s2395_s18  }
  0x13   : > { %s2053_s23 = sadd.s32 1, %s1964_s20   ;;  %s210_s24 = sadd.s32 1, %s1960_s0 }
  0x14   : > { %s207_s25 = ssub.s32 %s1964_s20, %s2053_s23  ;;  %p220_p5 = scmp.ne.s32.totalorder %s1960_s0, %s1956_s19 }
  0x15   : > { %p208_p6 = scmp.eq.s32.totalorder %s207_s25, 0  ;;  %p221_p7 = scmp.eq.s32.totalorder %s2049_s21, 1 }
  0x16   : > { %p226_p8 = scmp.ne.s32.totalorder %s1956_s19, %s1952_s18  ;;  %p227_p9 = scmp.eq.s32.totalorder %s1477_s22, 1 }
  0x17   : > { %s2064_s26 = scalar_select %p208_p6, %s1960_s0, %s210_s24  }
  0x18   : > { %p2066_p10 = por %p221_p7, %p220_p5  ;;  %p2070_p11 = por %p227_p9, %p226_p8 }
  0x19   : > { %p1480_p12 = scmp.ge.s32.totalorder %s1964_s20, 1  ;;  %p300_p13 = scmp.lt.s32.totalorder %s1964_s20, 3 }
  0x1b   : > { %p301_p0 = pnand %p1480_p12, %p300_p13 }
  0x1c   : > { %p338_p1 = scmp.lt.s32.totalorder (!%p301_p0), %s2049_s21, 1  ;;  %s2394_s1 = sld [smem:[#allocation8_spill]] (!%p301_p0) }
  0x1d   : > { %304 = sbr.rel (%p301_p0) target bundleno = 1303 (0x517), region = 52  ;;  %s1356_s15 = sld [smem:[#allocation3 + %s2049_s21]] (!%p301_p0) }
  0x1e   : > { %s1557_s25 = sshll.u32 (!%p301_p0), %s2049_s21, 4  ;;  %s1969_s17 = smov (!%p301_p0), [#allocation4]  }
  0x1f   : > { %s1398_s12 = scalar_lea.hbm (!%p301_p0), %s2389_s9, %s1557_s25  ;;  %s1906_s22 = sshll.u32 (!%p301_p0), %s1969_s17, 4  ;;  %s1907_s22 = int_to_ptr.vmem [resolvable:$false] %s1906_s22 }
  0x22   : > { %v1784_v0 = vld [vmem:[%s2383_s3 + $0x8] sm:$0x3f]   ;;  %vm410_vm0 = vcmask 1045504   ;;  %v1785_v2 = vld [vmem:[%s2383_s3] sm:$0x3f]   ;;  %s2087_s13 = scalar_select %p338_p1, %s2049_s21, 1 }
  0x23   : > { %1737 = vmatprep.subr.msk.bf16.mxu1 %vm410_vm0, %v1784_v0  ;;  %v412_v1 = vsel %vm410_vm0, %v1784_v0, 0  ;;  %1736 = vmatprep.subr.msk.bf16.mxu0 %vm410_vm0, %v1784_v0  ;;  %v1786_v3 = vld [vmem:[%s2383_s3 + $0x10] sm:$0x3f]   ;;  %vm391_vm1 = vcmask 97280   ;;  %v518_v12 = vsel %vm410_vm0, %v1785_v2, 0  ;;  %vm998_vm2 = vcmask 261120  }
  0x24   : > { %1735 = vmatpush3.bf16.msra.mxu1 %v412_v1  ;;  %1618 = vmatpush3.bf16.msra.mxu0 %v412_v1  ;;  %s1741_s16 = smul.u32 104, %s2087_s13  ;;  %v1787_v16 = vld [vmem:[%s2383_s3 + $0x18] sm:$0x3f]   ;;  %v644_v23 = vsel %vm410_vm0, %v1786_v3, 0  ;;  %vm1968_vm3 = vmmov 0   ;;  %vm1175_vm4 = vcmask 719872  }
  0x25   : > { %1738 = vmatprep.subr.msk.bf16.mxu1 %vm410_vm0, %v1785_v2  ;;  %1739 = vmatprep.subr.msk.bf16.mxu0 %vm410_vm0, %v1786_v3  ;;  %v781_v36 = vsel %vm410_vm0, %v1787_v16, 0  ;;  %v1788_v2 = vld [vmem:[%s2385_s5 + $0x8] sm:$0xff]   ;;  %v1789_v3 = vld [vmem:[%s2385_s5] sm:$0xff]   ;;  %vm1361_vm7 = vcmask 1040384  }
  0x26   : > { %s2098_s24 = scalar_lea.vmem %s2394_s1, %s1741_s16  ;;  %s331_s16 = sand.u32 1, %s1956_s19  }
  0x27   : > { %v370_v4 = vld [vmem:[%s2098_s24 + $0x21] sm:$0xff]  ;;  %v371_v5 = vld [vmem:[%s2098_s24 + $0x29] sm:$0xff]  ;;  %v372_v6 = vld [vmem:[%s2098_s24 + $0x31] sm:$0xff]  ;;  %s1385_s14 = scalar_lea.sflag [#allocation5], %s331_s16  ;;  %s1908_s1 = scalar_lea.vmem %s1907_s22, 32 }
  0x28   : > { %v379_v7 = vpack.c.bf16 %v371_v5, %v370_v4  ;;  %v373_v8 = vld [vmem:[%s2098_s24 + $0x39] sm:$0xff]  ;;  %v374_v9 = vld [vmem:[%s2098_s24 + $0x41] sm:$0xff]  ;;  %v375_v10 = vld [vmem:[%s2098_s24 + $0x49] sm:$0xff]  ;;  %v613_v33 = vpack.c.bf16 %v372_v6, %v371_v5 }
  0x29   : > { %v380_v11 = vpack.c.bf16 %v373_v8, %v372_v6  ;;  %v381_v13 = vpack.c.bf16 %v375_v10, %v374_v9  ;;  %v366_v14 = vld [vmem:[%s2098_s24 + $0x1] sm:$0xff]  ;;  %v367_v15 = vld [vmem:[%s2098_s24 + $0x9] sm:$0xff]  ;;  %v368_v18 = vld [vmem:[%s2098_s24 + $0x11] sm:$0xff]  ;;  %v614_v37 = vpack.c.bf16 %v374_v9, %v373_v8 }
  0x2a   : > { %1623 = vmatprep.mubr.msk.bf16.mxu1 %vm391_vm1, %v379_v7  ;;  %v377_v17 = vpack.c.bf16 %v367_v15, %v366_v14  ;;  %v369_v19 = vld [vmem:[%s2098_s24 + $0x19] sm:$0xff]  ;;  %v611_v21 = vpack.c.bf16 %v368_v18, %v367_v15  ;;  %v376_v22 = vld [vmem:[%s2098_s24 + $0x51] sm:$0xff]  ;;  %v348_v25 = vld [vmem:[%s2098_s24 + $0x8] sm:$0xff] }
  0x2b   : > { %1624 = vmatmul.mubr.msk.bf16.vlgmr.msra.gmra.mxu1 %vm391_vm1, %v380_v11  ;;  %v378_v20 = vpack.c.bf16 %v369_v19, %v368_v18  ;;  %v347_v24 = vld [vmem:[%s2098_s24] sm:$0xff]  ;;  %v382_v26 = vpack.c.bf16 %v376_v22, %v376_v22  ;;  %v349_v28 = vld [vmem:[%s2098_s24 + $0x10] sm:$0xff]  ;;  %v350_v29 = vld [vmem:[%s2098_s24 + $0x18] sm:$0xff]  ;;  %v612_v30 = vpack.c.bf16 %v370_v4, %v369_v19  ;;  %v615_v38 = vpack.c.bf16 %v376_v22, %v375_v10 }
  0x2c   : > { %1632 = vmatpush3.bf16.msra.mxu1 %v518_v12  ;;  %1627 = vmatprep.mubr.msk.bf16.mxu1 %vm391_vm1, %v381_v13  ;;  %v358_v27 = vpack.c.bf16 %v348_v25, %v347_v24  ;;  %v351_v31 = vld [vmem:[%s2098_s24 + $0x20] sm:$0xff]  ;;  %v352_v32 = vld [vmem:[%s2098_s24 + $0x28] sm:$0xff]  ;;  %v359_v34 = vpack.c.bf16 %v350_v29, %v349_v28  ;;  %v353_v39 = vld [vmem:[%s2098_s24 + $0x30] sm:$0xff] }
  0x2d   : > { %1619 = vmatprep.mubr.msk.bf16.mxu0 %vm391_vm1, %v377_v17  ;;  %1740 = vmatprep.subr.msk.bf16.mxu1 %vm410_vm0, %v1787_v16  ;;  %v360_v35 = vpack.c.bf16 %v352_v32, %v351_v31  ;;  %v354_v40 = vld [vmem:[%s2098_s24 + $0x38] sm:$0xff]  ;;  %v355_v41 = vld [vmem:[%s2098_s24 + $0x40] sm:$0xff]  ;;  %v356_v42 = vld [vmem:[%s2098_s24 + $0x48] sm:$0xff] }
  0x2e   : > { %1620 = vmatmul.mubr.msk.bf16.vlgmr.msra.gmra.mxu0 %vm391_vm1, %v378_v20  ;;  %v361_v43 = vpack.c.bf16 %v354_v40, %v353_v39  ;;  %v610_v44 = vld [vmem:[%s2098_s24 + $0x59] sm:$0xff]  ;;  %v362_v45 = vpack.c.bf16 %v356_v42, %v355_v41  ;;  %v357_v47 = vld [vmem:[%s2098_s24 + $0x50] sm:$0xff]  ;;  %v740_v53 = vld [vmem:[%s2098_s24 + $0x22] sm:$0xff] }
  0x2f   : > { %1646 = vmatpush3.bf16.msra.mxu0 %v644_v23  ;;  %1647 = vmatprep.mubr.msk.bf16.mxu0 %vm391_vm1, %v611_v21  ;;  %v616_v46 = vpack.c.bf16 %v610_v44, %v610_v44  ;;  %v737_v48 = vld [vmem:[%s2098_s24 + $0xa] sm:$0xff]  ;;  %v738_v49 = vld [vmem:[%s2098_s24 + $0x12] sm:$0xff]  ;;  %v363_v50 = vpack.c.bf16 %v357_v47, %v357_v47  ;;  %v739_v52 = vld [vmem:[%s2098_s24 + $0x1a] sm:$0xff] }
  0x30   : > { %v748_v51 = vpack.c.bf16 %v738_v49, %v737_v48  ;;  %v741_v54 = vld [vmem:[%s2098_s24 + $0x2a] sm:$0xff]  ;;  %v742_v55 = vld [vmem:[%s2098_s24 + $0x32] sm:$0xff]  ;;  %v749_v56 = vpack.c.bf16 %v740_v53, %v739_v52  ;;  %v743_v58 = vld [vmem:[%s2098_s24 + $0x3a] sm:$0xff]  ;;  %1673 = vmatprep.subr.bf16.mxu0 %v1788_v2 }
  0x31   : > { %v750_v57 = vpack.c.bf16 %v742_v55, %v741_v54  ;;  %v744_v59 = vld [vmem:[%s2098_s24 + $0x42] sm:$0xff]  ;;  %v745_v60 = vld [vmem:[%s2098_s24 + $0x4a] sm:$0xff]  ;;  %v746_v61 = vld [vmem:[%s2098_s24 + $0x52] sm:$0xff] }
  0x32   : > { %v751_v62 = vpack.c.bf16 %v744_v59, %v743_v58  ;;  %v752_v63 = vpack.c.bf16 %v746_v61, %v745_v60  ;;  %v747_v0 = vld [vmem:[%s2098_s24 + $0x5a] sm:$0xff]  ;;  %s332_s24 = scalar_lea.vmem [#allocation4], %s331_s16 }
  0x33   : > { %1628 = vmatmul.mubr.msk.bf16.gmra.mxu1 %vm391_vm1, %v382_v26  ;;  %v753_v1 = vpack.c.bf16 %v747_v0, %v747_v0  ;;  %v2180_v44 = vld [vmem:[%s2384_s4] ss:$0 sm:$0xff]  ;;  %s1400_s29 = sshll.u32 %s332_s24, 4  ;;  %s1401_s29 = int_to_ptr.vmem [resolvable:$true] %s1400_s29 }
  0x34   : > { %1633 = vmatprep.mubr.msk.bf16.mxu1 %vm391_vm1, %v358_v27  ;;  %p1909_p5 = scmp.lt.s32.totalorder %s1401_s29, %s1907_s22 }
  0x36   : > { %1648 = vmatmul.mubr.msk.bf16.vlgmr.msra.gmra.mxu0 %vm391_vm1, %v612_v30 }
  0x37   : > { %1651 = vmatprep.mubr.msk.bf16.mxu0 %vm391_vm1, %v613_v33  ;;  %1674 = vmatpush3.bf16.msra.mxu0 %v1788_v2 }
  0x38   : > { %1675 = vmatprep.subr.bf16.mxu0 %v1789_v3 }
  0x3b   : > { %1634 = vmatmul.mubr.msk.bf16.vlgmr.msra.gmra.mxu1 %vm391_vm1, %v359_v34  ;;  %1676 = vmatpush3.bf16.msra.mxu0 %v1789_v3 }
  0x3c   : > { %1660 = vmatpush3.bf16.msra.mxu1 %v781_v36  ;;  %1637 = vmatprep.mubr.msk.bf16.mxu1 %vm391_vm1, %v360_v35 }
  0x3e   : > { %1652 = vmatmul.mubr.msk.bf16.gmra.mxu0 %vm391_vm1, %v614_v37 }
  0x3f   : > { %1655 = vmatprep.mubr.msk.bf16.mxu0 %vm391_vm1, %v615_v38 }
  0x43   : > { %1638 = vmatmul.mubr.msk.bf16.gmra.mxu1 %vm391_vm1, %v361_v43 }
  0x44   : > { %1641 = vmatprep.mubr.msk.bf16.mxu1 %vm391_vm1, %v362_v45 }
  0x46   : > { %1656 = vmatmul.mubr.msk.bf16.gmra.mxu0 %vm391_vm1, %v616_v46 }
  0x4b   : > { %1642 = vmatmul.mubr.msk.bf16.gmra.mxu1 %vm391_vm1, %v363_v50 }
  0x4c   : > { %1661 = vmatprep.mubr.msk.bf16.mxu1 %vm391_vm1, %v748_v51 }
  0x53   : > { %1662 = vmatmul.mubr.msk.bf16.vlgmr.msra.gmra.mxu1 %vm391_vm1, %v749_v56 }
  0x54   : > { %1665 = vmatprep.mubr.msk.bf16.mxu1 %vm391_vm1, %v750_v57 }
  0x5b   : > { %1666 = vmatmul.mubr.msk.bf16.gmra.mxu1 %vm391_vm1, %v751_v62 }
  0x5c   : > { %1669 = vmatprep.mubr.msk.bf16.mxu1 %vm391_vm1, %v752_v63 }
  0x63   : > { %1670 = vmatmul.mubr.msk.bf16.gmra.mxu1 %vm391_vm1, %v753_v1 }
  0xeb   : > { %v1625_v4 = vpop.f32.mrf.mxu1 }
  0xed   : > { %v464_v5 = vpop.f32.mrf.mxu1 }
  0xee   : > { %v1621_v6 = vpop.f32.mrf.mxu0 }
  0xef   : > { %v1626_v7 = vpop.f32.mrf.mxu1 }
  0xf0   : > { %v448_v8 = vpop.f32.mrf.mxu0 }
  0xf1   : > { %v467_v9 = vpop.f32.mrf.mxu1 }
  0xf2   : > { %v1622_v10 = vpop.f32.mrf.mxu0 }
  0xf3   : > { %v2171_v11 = vpop.f32.mrf.mxu1 }
  0xf4   : > { %v451_v12 = vpop.f32.mrf.mxu0 }
  0xf5   : > { %v2173_v13 = vpop.f32.mrf.mxu1 }
  0xf6   : > { %v1649_v14 = vpop.f32.mrf.mxu0 }
  0xf7   : > { %v1630_v15 = vpop.f32.mrf.mxu1 }
  0xf8   : > { %v680_v16 = vpop.f32.mrf.mxu0 }
  0xf9   : > { %v2175_v17 = vpop.f32.mrf.mxu1 }
  0xfa   : > { %v1650_v18 = vpop.f32.mrf.mxu0 }
  0xfb   : > { %v1635_v19 = vpop.f32.mrf.mxu1 }
  0xfc   : > { %v683_v20 = vpop.f32.mrf.mxu0  ;;  %v563_v37 = vadd.f32 %v1635_v19, %v1621_v6 }
  0xfd   : > { %v554_v21 = vpop.f32.mrf.mxu1 }
  0xfe   : > { %v1653_v22 = vpop.f32.mrf.mxu0  ;;  %v555_v39 = vadd.f32 %v554_v21, %v448_v8  ;;  %v728_v41 = vadd.f32 %v1649_v14, %v563_v37 }
  0xff   : > { %v1636_v23 = vpop.f32.mrf.mxu1 }
 0x100   : > { %v696_v24 = vpop.f32.mrf.mxu0  ;;  %v566_v42 = vadd.f32 %v1636_v23, %v1622_v10  ;;  %v726_v45 = vadd.f32 %v680_v16, %v555_v39 }
 0x101   : > { %v557_v25 = vpop.f32.mrf.mxu1 }
 0x102   : > { %v1654_v26 = vpop.f32.mrf.mxu0  ;;  %v558_v46 = vadd.f32 %v557_v25, %v451_v12  ;;  %v729_v49 = vadd.f32 %v1650_v18, %v566_v42 }
 0x103   : > { %v1639_v27 = vpop.f32.mrf.mxu1 }
 0x104   : > { %v699_v28 = vpop.f32.mrf.mxu0  ;;  %v579_v50 = vadd.f32 %v1639_v27, %v1625_v4  ;;  %v727_v55 = vadd.f32 %v683_v20, %v558_v46 }
 0x105   : > { %v570_v29 = vpop.f32.mrf.mxu1 }
 0x106   : > { %v1657_v30 = vpop.f32.mrf.mxu0  ;;  %v571_v53 = vadd.f32 %v570_v29, %v464_v5  ;;  %v732_v61 = vadd.f32 %v1653_v22, %v579_v50 }
 0x107   : > { %v1640_v31 = vpop.f32.mrf.mxu1 }
 0x108   : > { %v712_v32 = vpop.f32.mrf.mxu0  ;;  %v582_v59 = vadd.f32 %v1640_v31, %v1626_v7  ;;  %v730_v1 = vadd.f32 %v696_v24, %v571_v53 }
 0x109   : > { %v573_v33 = vpop.f32.mrf.mxu1 }
 0x10a   : > { %v1658_v34 = vpop.f32.mrf.mxu0  ;;  %v574_v2 = vadd.f32 %v573_v33, %v467_v9  ;;  %v733_v7 = vadd.f32 %v1654_v26, %v582_v59 }
 0x10b   : > { %v1643_v35 = vpop.f32.mrf.mxu1 }
 0x10c   : > { %v595_v8 = vadd.f32 %v1643_v35, %v2171_v11  ;;  %v731_v15 = vadd.f32 %v699_v28, %v574_v2  ;;  %v715_v33 = vpop.f32.mrf.mxu0 }
 0x10d   : > { %v586_v36 = vpop.f32.mrf.mxu1 }
 0x10e   : > { %v587_v16 = vadd.f32 %v586_v36, %v2173_v13  ;;  %v736_v22 = vadd.f32 %v1657_v30, %v595_v8 }
 0x10f   : > { %v1644_v38 = vpop.f32.mrf.mxu1 }
 0x110   : > { %v734_v26 = vadd.f32 %v712_v32, %v587_v16 }
 0x111   : > { %v589_v40 = vpop.f32.mrf.mxu1 }
 0x112   : > { %v590_v27 = vadd.f32 %v589_v40, %v2175_v17 }
 0x113   : > { %v1663_v43 = vpop.f32.mrf.mxu1 }
 0x114   : > { %v865_v47 = vadd.f32 %v1663_v43, %v728_v41  ;;  %v735_v37 = vadd.f32 %v715_v33, %v590_v27 }
 0x115   : > { %v817_v48 = vpop.f32.mrf.mxu1 }
 0x116   : > { %v2183_v51 = vadd.f32 %v2180_v44, %v865_v47  ;;  %v863_v52 = vadd.f32 %v817_v48, %v726_v45 }
 0x117   : > { %v1664_v54 = vpop.f32.mrf.mxu1 }
 0x118   : > { %v1519_v56 = vmul.f32 -1.442695, %v2183_v51  ;;  %v2187_v57 = vadd.f32 %v2180_v44, %v863_v52  ;;  %v866_v58 = vadd.f32 %v1664_v54, %v729_v49 }
 0x119   : > { %v820_v60 = vpop.f32.mrf.mxu1 }
 0x11a   : > { %v1517_v62 = vmul.f32 -1.442695, %v2187_v57  ;;  %v2191_v63 = vadd.f32 %v2180_v44, %v866_v58  ;;  %v864_v0 = vadd.f32 %v820_v60, %v727_v55  ;;  %1798 = vpow2.f32 %v1519_v56 }
 0x11b   : > { %v1667_v3 = vpop.f32.mrf.mxu1 }
 0x11c   : > { %1800 = vpow2.f32 %v1517_v62  ;;  %v1520_v4 = vmul.f32 -1.442695, %v2191_v63  ;;  %v2195_v5 = vadd.f32 %v2180_v44, %v864_v0  ;;  %v869_v6 = vadd.f32 %v1667_v3, %v732_v61 }
 0x11d   : > { %v833_v10 = vpop.f32.mrf.mxu1 }
 0x11e   : > { %1802 = vpow2.f32 %v1520_v4  ;;  %v1518_v12 = vmul.f32 -1.442695, %v2195_v5  ;;  %v2200_v14 = vadd.f32 %v2180_v44, %v869_v6  ;;  %v867_v9 = vadd.f32 %v833_v10, %v730_v1 }
 0x11f   : > { %v1668_v18 = vpop.f32.mrf.mxu1 }
 0x120   : > { %1804 = vpow2.f32 %v1518_v12  ;;  %v1523_v19 = vmul.f32 -1.442695, %v2200_v14  ;;  %v2205_v20 = vadd.f32 %v2180_v44, %v867_v9  ;;  %v870_v21 = vadd.f32 %v1668_v18, %v733_v7 }
 0x121   : > { %v836_v11 = vpop.f32.mrf.mxu1 }
 0x122   : > { %v1521_v23 = vmul.f32 -1.442695, %v2205_v20  ;;  %v2209_v24 = vadd.f32 %v2180_v44, %v870_v21  ;;  %v868_v25 = vadd.f32 %v836_v11, %v731_v15  ;;  %1806 = vpow2.f32 %v1523_v19 }
 0x123   : > { %v1671_v13 = vpop.f32.mrf.mxu1 }
 0x124   : > { %1808 = vpow2.f32 %v1521_v23  ;;  %v1524_v28 = vmul.f32 -1.442695, %v2209_v24  ;;  %v2214_v29 = vadd.f32 %v2180_v44, %v868_v25  ;;  %v873_v31 = vadd.f32 %v1671_v13, %v736_v22 }
 0x125   : > { %v849_v30 = vpop.f32.mrf.mxu1 }
 0x126   : > { %1810 = vpow2.f32 %v1524_v28  ;;  %v1522_v34 = vmul.f32 -1.442695, %v2214_v29  ;;  %v2218_v35 = vadd.f32 %v2180_v44, %v873_v31  ;;  %v871_v32 = vadd.f32 %v849_v30, %v734_v26 }
 0x127   : > { %v1672_v36 = vpop.f32.mrf.mxu1  ;;  %v1799_v17 = vpop.eup %1798 }
 0x128   : > { %1812 = vpow2.f32 %v1522_v34  ;;  %v1527_v38 = vmul.f32 -1.442695, %v2218_v35  ;;  %v2222_v39 = vadd.f32 %v2180_v44, %v871_v32  ;;  %v927_v47 = vadd.f32 1.0, %v1799_v17  ;;  %v1791_v34 = vld [vmem:[%s2387_s7 + $0x30] sm:$0xff]   ;;  %v1793_v32 = vld [vmem:[%s2387_s7 + $0x20] sm:$0xff]   ;;  %v1794_v36 = vld [vmem:[%s2387_s7 + $0x18] sm:$0xff]  }
 0x129   : > { %v1801_v40 = vpop.eup %1800  ;;  %v852_v41 = vpop.f32.mrf.mxu1  ;;  %v1795_v17 = vld [vmem:[%s2387_s7 + $0x10] sm:$0xff]  }
 0x12a   : > { %v925_v42 = vadd.f32 1.0, %v1801_v40  ;;  %v1525_v43 = vmul.f32 -1.442695, %v2222_v39  ;;  %v872_v45 = vadd.f32 %v852_v41, %v735_v37  ;;  %1814 = vpow2.f32 %v1527_v38  ;;  %v1796_v37 = vld [vmem:[%s2387_s7 + $0x8] sm:$0xff]  }
 0x12b   : > { %v1803_v46 = vpop.eup %1802 }
 0x12c   : > { %1816 = vrcp.f32 %v925_v42  ;;  %v928_v48 = vadd.f32 1.0, %v1803_v46  ;;  %v890_v49 = vadd.f32 %v2180_v44, %v872_v45 }
 0x12d   : > { %v1805_v50 = vpop.eup %1804  ;;  %1818 = vpow2.f32 %v1525_v43 }
 0x12e   : > { %1820 = vrcp.f32 %v928_v48  ;;  %v926_v52 = vadd.f32 1.0, %v1805_v50  ;;  %v1526_v53 = vmul.f32 -1.442695, %v890_v49 }
 0x12f   : > { %1822 = vrcp.f32 %v927_v47  ;;  %v1807_v54 = vpop.eup %1806  ;;  %v1528_v47 = vld [vmem:[%s2386_s6] ss:$0 sm:$0xff] }
 0x130   : > { %1824 = vrcp.f32 %v926_v52  ;;  %v931_v59 = vadd.f32 1.0, %v1807_v54 }
 0x131   : > { %v1809_v55 = vpop.eup %1808  ;;  %1826 = vpow2.f32 %v1526_v53 }
 0x132   : > { %v929_v56 = vadd.f32 1.0, %v1809_v55 }
 0x133   : > { %v1811_v58 = vpop.eup %1810 }
 0x134   : > { %v932_v60 = vadd.f32 1.0, %v1811_v58  ;;  %1828 = vrcp.f32 %v929_v56 }
 0x135   : > { %v1813_v61 = vpop.eup %1812 }
 0x136   : > { %1830 = vrcp.f32 %v932_v60  ;;  %v930_v62 = vadd.f32 1.0, %v1813_v61 }
 0x137   : > { %1832 = vrcp.f32 %v931_v59  ;;  %v1815_v44 = vpop.eup %1814 }
 0x138   : > { %1834 = vrcp.f32 %v930_v62  ;;  %v935_v2 = vadd.f32 1.0, %v1815_v44 }
 0x139   : > { %v1817_v0 = vpop.eup %1816 }
 0x13a   : > { %v1819_v1 = vpop.eup %1818  ;;  %v958_v12 = vmul.f32 %v1817_v0, %v2187_v57  ;;  %1836 = vrcp.f32 %v935_v2 }
 0x13b   : > { %v1821_v3 = vpop.eup %1820  ;;  %v933_v4 = vadd.f32 1.0, %v1819_v1 }
 0x13c   : > { %v1823_v6 = vpop.eup %1822  ;;  %v961_v8 = vmul.f32 %v1821_v3, %v2191_v63 }
 0x13d   : > { %v1825_v7 = vpop.eup %1824  ;;  %v960_v15 = vmul.f32 %v1823_v6, %v2183_v51  ;;  %1838 = vrcp.f32 %v933_v4 }
 0x13e   : > { %v1827_v10 = vpop.eup %1826  ;;  %v959_v9 = vmul.f32 %v1825_v7, %v2195_v5 }
 0x13f   : > { %v934_v16 = vadd.f32 1.0, %v1827_v10  ;;  %v970_v19 = vpack.c.bf16 %v961_v8, %v960_v15 }
 0x140   : > { %v969_v18 = vpack.c.bf16 %v959_v9, %v958_v12 }
 0x141   : > { %1840 = vrcp.f32 %v934_v16  ;;  %v1829_v21 = vpop.eup %1828 }
 0x142   : > { %1677 = vmatprep.mubr.msk.bf16.mxu0 %vm998_vm2, %v969_v18  ;;  %v962_v5 = vmul.f32 %v1829_v21, %v2205_v20 }
 0x143   : > { %v1831_v11 = vpop.eup %1830  ;;  %1678 = vmatmul.mubr.msk.bf16.vlgmr.msra.gmra.mxu0 %vm998_vm2, %v970_v19 }
 0x144   : > { %v1833_v63 = vpop.eup %1832  ;;  %v965_v57 = vmul.f32 %v1831_v11, %v2209_v24 }
 0x145   : > { %v1835_v22 = vpop.eup %1834  ;;  %v964_v23 = vmul.f32 %v1833_v63, %v2200_v14  ;;  %v1967_v14 = vmov 0.0  }
 0x146   : > { %v963_v51 = vmul.f32 %v1835_v22, %v2214_v29  ;;  %1689 = vmatprep.subr.mxu1 %v1967_v14  ;;  %1714 = vmatprep.subr.bf16.mxu0 %v1967_v14  ;;  %v1790_v29 = vld [vmem:[%s2387_s7 + $0x38] sm:$0xff]  }
 0x147   : > { %v972_v26 = vpack.c.bf16 %v965_v57, %v964_v23  ;;  %v1837_v27 = vpop.eup %1836  ;;  %1711 = vmatprep.mubr.msk.f32.mxu1 %vm1968_vm3, %v1967_v14  ;;  %1715 = vmatpush3.bf16.msra.mxu0 %v1790_v29 }
 0x148   : > { %v971_v25 = vpack.c.bf16 %v963_v51, %v962_v5  ;;  %v968_v31 = vmul.f32 %v1837_v27, %v2218_v35  ;;  %1716 = vmatprep.subr.bf16.mxu0 %v1967_v14  ;;  %v1792_v35 = vld [vmem:[%s2387_s7 + $0x28] sm:$0xff]  }
 0x14a   : > { %1681 = vmatprep.mubr.msk.bf16.mxu0 %vm998_vm2, %v971_v25  ;;  %v1839_v13 = vpop.eup %1838  ;;  %v974_v20 = vpack.c.bf16 %v968_v31, %v968_v31 }
 0x14b   : > { %1682 = vmatmul.mubr.msk.bf16.gmra.mxu0 %vm998_vm2, %v972_v26  ;;  %v966_v33 = vmul.f32 %v1839_v13, %v2222_v39 }
 0x14c   : > { %1717 = vmatpush3.bf16.msra.mxu0 %v1791_v34 }
 0x14d   : > { %1718 = vmatprep.subr.bf16.mxu0 %v1967_v14 }
 0x14e   : > { %v1841_v28 = vpop.eup %1840 }
 0x14f   : > { %v967_v24 = vmul.f32 %v1841_v28, %v890_v49 }
 0x150   : > { %1719 = vmatpush3.bf16.msra.mxu0 %v1792_v35 }
 0x151   : > { %v973_v30 = vpack.c.bf16 %v967_v24, %v966_v33  ;;  %1720 = vmatprep.subr.bf16.mxu0 %v1967_v14 }
 0x153   : > { %1685 = vmatprep.mubr.msk.bf16.mxu0 %vm998_vm2, %v973_v30 }
 0x154   : > { %1686 = vmatmul.mubr.msk.bf16.gmra.mxu0 %vm998_vm2, %v974_v20 }
 0x155   : > { %1730 = vmatprep.mubr.msk.bf16.mxu0 %vm1968_vm3, %v1967_v14  ;;  %1721 = vmatpush3.bf16.msra.mxu0 %v1793_v32 }
 0x156   : > { %1722 = vmatprep.subr.bf16.mxu0 %v1967_v14 }
 0x159   : > { %1723 = vmatpush3.bf16.msra.mxu0 %v1794_v36 }
 0x15a   : > { %1724 = vmatprep.subr.bf16.mxu0 %v1967_v14 }
 0x15d   : > { %1725 = vmatpush3.bf16.msra.mxu0 %v1795_v17 }
 0x15e   : > { %1726 = vmatprep.subr.bf16.mxu0 %v1967_v14 }
 0x161   : > { %1727 = vmatpush3.bf16.msra.mxu0 %v1796_v37 }
 0x162   : > { %1728 = vmatprep.subr.bf16.mxu0 %v1967_v14 }
 0x203   : > { %v1679_v38 = vpop.f32.mrf.mxu0 }
 0x204   : > { %v2293_v4 = vadd.f32 %v1679_v38, %v1528_v47 }
 0x205   : > { %v1051_v39 = vpop.f32.mrf.mxu0 }
 0x206   : > { %v1539_v10 = vmul.f32 -1.442695, %v2293_v4  ;;  %v2300_v12 = vadd.f32 %v1528_v47, %v1051_v39 }
 0x207   : > { %v1680_v40 = vpop.f32.mrf.mxu0 }
 0x208   : > { %v2290_v1 = vadd.f32 %v1680_v40, %v1528_v47  ;;  %v1537_v16 = vmul.f32 -1.442695, %v2300_v12 }
 0x209   : > { %v1054_v41 = vpop.f32.mrf.mxu0 }
 0x20a   : > { %v2296_v7 = vadd.f32 %v1528_v47, %v1054_v41  ;;  %v1540_v8 = vmul.f32 -1.442695, %v2290_v1 }
 0x20b   : > { %v1683_v42 = vpop.f32.mrf.mxu0 }
 0x20c   : > { %v2279_v52 = vadd.f32 %v1683_v42, %v1528_v47  ;;  %v1538_v9 = vmul.f32 -1.442695, %v2296_v7 }
 0x20d   : > { %v1067_v43 = vpop.f32.mrf.mxu0 }
 0x20e   : > { %v1543_v61 = vmul.f32 -1.442695, %v2279_v52  ;;  %v2288_v44 = vadd.f32 %v1528_v47, %v1067_v43 }
 0x20f   : > { %v1684_v45 = vpop.f32.mrf.mxu0 }
 0x210   : > { %v2277_v49 = vadd.f32 %v1684_v45, %v1528_v47  ;;  %v1541_v6 = vmul.f32 -1.442695, %v2288_v44 }
 0x211   : > { %v1070_v46 = vpop.f32.mrf.mxu0 }
 0x212   : > { %v1544_v58 = vmul.f32 -1.442695, %v2277_v49  ;;  %v2284_v59 = vadd.f32 %v1528_v47, %v1070_v46 }
 0x214   : > { %v1687_v48 = vpop.f32.mrf.mxu0  ;;  %v1542_v2 = vmul.f32 -1.442695, %v2284_v59 }
 0x215   : > { %v1092_v50 = vadd.f32 %v1687_v48, %v1528_v47 }
 0x216   : > { %v1083_v53 = vpop.f32.mrf.mxu0 }
 0x217   : > { %v1547_v54 = vmul.f32 -1.442695, %v1092_v50  ;;  %v2281_v55 = vadd.f32 %v1528_v47, %v1083_v53 }
 0x218   : > { %v1688_v56 = vpop.f32.mrf.mxu0 }
 0x219   : > { %1842 = vpow2.f32 %v1547_v54  ;;  %v1545_v60 = vmul.f32 -1.442695, %v2281_v55  ;;  %v1174_v56 = vld [vmem:[%s2382_s2] sm:$0x1] }
 0x21a   : > { %v1086_v62 = vpop.f32.mrf.mxu0 }
 0x21b   : > { %1844 = vpow2.f32 %v1545_v60  ;;  %v1087_v0 = vadd.f32 %v1528_v47, %v1086_v62  ;;  %v1357_v62 = vlaneseq }
 0x21c   : > { %1846 = vpow2.f32 %v1544_v58  ;;  %v1797_v58 = vld [vmem:[%s2387_s7] sm:$0xff]  }
 0x21d   : > { %v1546_v3 = vmul.f32 -1.442695, %v1087_v0  ;;  %1848 = vpow2.f32 %v1543_v61  ;;  %1729 = vmatpush3.bf16.msra.mxu0 %v1797_v58 }
 0x21f   : > { %1850 = vpow2.f32 %v1546_v3 }
 0x220   : > { %1852 = vpow2.f32 %v1542_v2 }
 0x221   : > { %1854 = vpow2.f32 %v1541_v6 }
 0x222   : > { %1856 = vpow2.f32 %v1540_v8 }
 0x223   : > { %1858 = vpow2.f32 %v1539_v10 }
 0x224   : > { %1860 = vpow2.f32 %v1538_v9 }
 0x226   : > { %v1843_v15 = vpop.eup %1842 }
 0x227   : > { %v1140_v18 = vadd.f32 1.0, %v1843_v15 }
 0x228   : > { %v1845_v19 = vpop.eup %1844 }
 0x229   : > { %1862 = vrcp.f32 %v1140_v18  ;;  %v1847_v21 = vpop.eup %1846  ;;  %v1138_v11 = vadd.f32 1.0, %v1845_v19 }
 0x22a   : > { %v1849_v63 = vpop.eup %1848  ;;  %1864 = vpow2.f32 %v1537_v16  ;;  %v1137_v57 = vadd.f32 1.0, %v1847_v21 }
 0x22b   : > { %1866 = vrcp.f32 %v1138_v11  ;;  %v1136_v23 = vadd.f32 1.0, %v1849_v63 }
 0x22c   : > { %v1851_v22 = vpop.eup %1850 }
 0x22d   : > { %v1139_v5 = vadd.f32 1.0, %v1851_v22  ;;  %v1853_v51 = vpop.eup %1852 }
 0x22e   : > { %v1855_v25 = vpop.eup %1854  ;;  %v1135_v26 = vadd.f32 1.0, %v1853_v51 }
 0x22f   : > { %1868 = vrcp.f32 %v1139_v5  ;;  %v1857_v27 = vpop.eup %1856  ;;  %v1134_v13 = vadd.f32 1.0, %v1855_v25 }
 0x230   : > { %1870 = vrcp.f32 %v1137_v57  ;;  %v1859_v28 = vpop.eup %1858  ;;  %v1133_v33 = vadd.f32 1.0, %v1857_v27 }
 0x231   : > { %1872 = vrcp.f32 %v1136_v23  ;;  %v1861_v31 = vpop.eup %1860  ;;  %v1132_v30 = vadd.f32 1.0, %v1859_v28 }
 0x232   : > { %1874 = vrcp.f32 %v1135_v26  ;;  %v1131_v34 = vadd.f32 1.0, %v1861_v31 }
 0x233   : > { %1876 = vrcp.f32 %v1134_v13 }
 0x234   : > { %1878 = vrcp.f32 %v1133_v33 }
 0x235   : > { %1880 = vrcp.f32 %v1132_v30 }
 0x236   : > { %v1863_v24 = vpop.eup %1862  ;;  %1882 = vrcp.f32 %v1131_v34 }
 0x237   : > { %v1173_v20 = vmul.f32 %v1863_v24, %v1092_v50  ;;  %v1865_v29 = vpop.eup %1864 }
 0x238   : > { %v1867_v35 = vpop.eup %1866  ;;  %v1130_v32 = vadd.f32 1.0, %v1865_v29 }
 0x239   : > { %1690 = vmatpush3.msra.mxu1 %v1173_v20  ;;  %v1171_v38 = vmul.f32 %v1867_v35, %v2281_v55 }
 0x23a   : > { %1691 = vmatprep.subr.mxu1 %v1967_v14  ;;  %1884 = vrcp.f32 %v1130_v32 }
 0x23c   : > { %v1869_v36 = vpop.eup %1868 }
 0x23d   : > { %v1172_v17 = vmul.f32 %v1869_v36, %v1087_v0  ;;  %v1871_v37 = vpop.eup %1870  ;;  %v1375_v0 = vstv %s1356_s15  ;;  %s1902_s15 = scalar_lea.vmem %s1401_s29, 16 }
 0x23e   : > { %v1873_v39 = vpop.eup %1872  ;;  %v1170_v40 = vmul.f32 %v1871_v37, %v2277_v49  ;;  %p1903_p2 = scmp.ne.s32.totalorder %s1401_s29, %s1902_s15  ;;  %p1910_p6 = scmp.lt.s32.totalorder %s1908_s1, %s1902_s15 }
 0x23f   : > { %1692 = vmatpush3.msra.mxu1 %v1172_v17  ;;  %v1875_v41 = vpop.eup %1874  ;;  %v1169_v42 = vmul.f32 %v1873_v39, %v2279_v52 }
 0x240   : > { %1693 = vmatprep.subr.mxu1 %v1967_v14  ;;  %v1877_v43 = vpop.eup %1876  ;;  %v1168_v45 = vmul.f32 %v1875_v41, %v2284_v59  ;;  %p1904_p3 = pnand %p1903_p2, %p2066_p10  ;;  %p1911_p7 = por %p1910_p6, %p1909_p5 }
 0x241   : > { %1694 = vmatpush3.msra.mxu1 %v1171_v38  ;;  %v1879_v46 = vpop.eup %1878  ;;  %v1167_v47 = vmul.f32 %v1877_v43, %v2288_v44  ;;  %v1358_v44 = vand.u32 127, %v1357_v62 }
 0x242   : > { %1695 = vmatprep.subr.mxu1 %v1967_v14  ;;  %v1881_v48 = vpop.eup %1880  ;;  %v1166_v49 = vmul.f32 %v1879_v46, %v2290_v1  ;;  %p1905_p4 = pneg %p1904_p3 }
 0x243   : > { %1696 = vmatpush3.msra.mxu1 %v1170_v40  ;;  %v1883_v50 = vpop.eup %1882  ;;  %v1165_v52 = vmul.f32 %v1881_v48, %v2293_v4  ;;  %vm1359_vm5 = vcmp.lt.s32.totalorder %v1358_v44, 2  ;;  %vm1376_vm6 = vcmp.eq.s32.totalorder %v1358_v44, %v1375_v0 }
 0x244   : > { %1697 = vmatprep.subr.mxu1 %v1967_v14  ;;  %v1164_v54 = vmul.f32 %v1883_v50, %v2296_v7  ;;  %p1912_p8 = pnand %p1911_p7, %p1905_p4 }
 0x245   : > { %1698 = vmatpush3.msra.mxu1 %v1169_v42 }
 0x246   : > { %1699 = vmatprep.subr.mxu1 %v1967_v14 }
 0x247   : > { %1700 = vmatpush3.msra.mxu1 %v1168_v45  ;;  %v1885_v53 = vpop.eup %1884 }
 0x248   : > { %1701 = vmatprep.subr.mxu1 %v1967_v14  ;;  %v1163_v55 = vmul.f32 %v1885_v53, %v2300_v12 }
 0x249   : > { %1702 = vmatpush3.msra.mxu1 %v1167_v47 }
 0x24a   : > { %1703 = vmatprep.subr.mxu1 %v1967_v14 }
 0x24b   : > { %1704 = vmatpush3.msra.mxu1 %v1166_v49 }
 0x24c   : > { %1705 = vmatprep.subr.mxu1 %v1967_v14 }
 0x24d   : > { %1706 = vmatpush3.msra.mxu1 %v1165_v52 }
 0x24e   : > { %1707 = vmatprep.subr.mxu1 %v1967_v14 }
 0x24f   : > { %1708 = vmatpush3.msra.mxu1 %v1164_v54 }
 0x250   : > { %1709 = vmatprep.subr.mxu1 %v1967_v14  ;;  %v1266_v14 = vld [vmem:[%s2388_s8] sm:$0x1] }
 0x251   : > { %1710 = vmatpush3.msra.mxu1 %v1163_v55 }
 0x252   : > { %1712 = vmatmul.mubr.msk.f32.vlgmr.msra.gmra.mxu1 %vm1175_vm4, %v1174_v56 }
 0x312   : > { %v1245_v59 = vpop.f32.mrf.mxu1 }
 0x313   : > { %v1249_v60 = vpack.c.bf16 %v1245_v59, %v1245_v59 }
 0x314   : > { %v1713_v61 = vpop.f32.mrf.mxu1 }
 0x315   : > { %1731 = vmatmul.mubr.bf16.vlgmr.msra.gmra.mxu0 %v1249_v60 }
 0x3d5   : > { %v1349_v1 = vpop.f32.mrf.mxu0 }
 0x3d6   : > { %v1350_v2 = vadd.f32 %v1349_v1, %v1266_v14 }
 0x3d7   : > { %v1732_v3 = vpop.f32.mrf.mxu0 }
 0x3d8   : > { %v1360_v4 = vsel %vm1359_vm5, %v1350_v2, -1e+30  ;;  %v1377_v6 = vsel %vm1376_vm6, %v1350_v2, 0.0  ;;  %1355 = vst [vmem:[%s332_s24] sm:$0x1] %v1350_v2 }
 0x3d9   : > { %v1352_v7 = vpop.f32.mrf.mxu0  ;;  %v1362_v8 = vsel %vm1361_vm7, %v1360_v4, -inf  ;;  %v1378_v10 = vsel %vm1361_vm7, %v1377_v6, 0.0 }
 0x3da   : > { %1363 = vmax.xlane.f32.xlu0 %v1362_v8  ;;  %1379 = vadd.xlane.f32.xlu1 %v1378_v10 }
 0x3db   : > { %v1733_v12 = vpop.f32.mrf.mxu0 }
 0x463   : > { %v1364_v9 = vpop.xlane.xlu0 %1363 }
 0x464   : > { %v1365_v15 = vsub.f32 %v1360_v4, %v1364_v9 }
 0x466   : > { %v1366_v16 = vmul.f32 1.442695, %v1365_v15 }
 0x468   : > { %1886 = vpow2.f32 %v1366_v16 }
 0x475   : > { %v1887_v18 = vpop.eup %1886 }
 0x476   : > { %v1368_v19 = vsel %vm1359_vm5, %v1887_v18, 0.0 }
 0x477   : > { %v1369_v21 = vsel %vm1361_vm7, %v1368_v19, 0.0 }
 0x478   : > { %1370 = vadd.xlane.f32.xlu0 %v1369_v21 }
 0x479   : > { %1915 = shalt.err (!%p1912_p8)
}
 0x47a   : > { %s1916_s21 = scalar_lea.hbm %s1398_s12, 16  ;;  %s1920_s25 = scalar_lea.hbm %s2389_s9, 32 }
 0x47b   : > { %p1917_p9 = scmp.ne.s32.totalorder %s1398_s12, %s1916_s21  ;;  %p1921_p0 = scmp.lt.s32.totalorder %s1398_s12, %s2389_s9 }
 0x47c   : > { %p1922_p1 = scmp.lt.s32.totalorder %s1920_s25, %s1916_s21 }
 0x47d   : > { %p1918_p12 = pnand %p1917_p9, %p2066_p10 }
 0x47e   : > { %p1923_p2 = por %p1922_p1, %p1921_p0 }
 0x47f   : > { %p1919_p13 = pneg %p1918_p12 }
 0x481   : > { %p1924_p3 = pnand %p1923_p2, %p1919_p13 }
 0x483   : > { %1927 = shalt.err (!%p1924_p3)
}
 0x484   : > { %1742 = dma.vmem_to_hbm [thread:$0]  (%p2066_p10), %s1401_s29, 16, %s1398_s12, %s1385_s14   ;;  %v1380_v5 = vpop.xlane.xlu1 %1379  ;;  %vm1382_vm8 = vcmask 0  }
 0x485   : > { %s345_s17 = scalar_lea.vmem %s2390_s10, %s2087_s13 }
 0x501   : > { %v1371_v11 = vpop.xlane.xlu0 %1370 }
 0x502   : > { %1888 = vlog2.f32 %v1371_v11 }
 0x50f   : > { %v1889_v63 = vpop.eup %1888 }
 0x510   : > { %v1373_v22 = vmul.f32 0.6931472, %v1889_v63 }
 0x512   : > { %v1374_v57 = vadd.f32 %v1373_v22, %v1364_v9 }
 0x514   : > { %v1381_v51 = vsub.f32 %v1374_v57, %v1380_v5 }
 0x516   : > { %1383 = vst.msk [vmem:[%s345_s17] sm:$0x1] %vm1382_vm8, %v1381_v51 }
 0x517 PF: > { %p1748_p4 = scmp.ge.s32.totalorder %s1964_s20, 2  ;;  %s1415_s27 = sand.u32 1, %s1952_s18  }
 0x518   : > { %s1416_s29 = scalar_lea.sflag [#allocation5], %s1415_s27 }
 0x519   : > { %p1745_p10 = pnand %p1748_p4, %p2070_p11 }
 0x51b   : > { %p1746_p5 = pneg %p1745_p10 }
 0x51d   : > { %1947 = dma.done.wait (%p1746_p5), %s1416_s29, 16  }
 0x51e   : > { %1949 = vsyncadd (%p1746_p5), %s1416_s29, 4294967280  ;;  %p27_p6 = scmp.ge.s32.totalorder %s2053_s23, 4   ;;  %s2395_s18 = smov %s1956_s19 }
 0x51f   : > { %s2396_s19 = smov %s1960_s0  ;;  %s2397_s0 = smov %s2064_s26 }
 0x520   : > { %s2398_s20 = smov %s2053_s23  ;;  %29 = sbr.rel (!%p27_p6) target bundleno = 18 (0x12), region = 102 }
 0x525   :  { %1426 = vsyncpa [#allocation5], 1 }
 0x526   :  { %1428 = vsyncpa [#allocation5 + $0x1], 1 }

</bundles_post_ra>
